<compile_context>
chip_gen: v6e
topology: v6e:2x2x1
jax: 0.10.0
libtpu: 0.0.40
codegen_flags: <defaults>
</compile_context>

<pallas_src>
import functools
from typing import NamedTuple

import jax
import jax.numpy as jnp
from jax import lax
from jax.experimental import pallas as pl
from jax.experimental.pallas import tpu as pltpu

LN_EPS = 1e-5  # PyTorch nn.LayerNorm default


def _round_up(x, m):
    return (x + m - 1) // m * m


def _cdiv(a, b):
    return (a + b - 1) // b


def _vmem_budget_bytes():
    """Usable VMEM budget with headroom below physical capacity."""
    try:
        cap = int(pltpu.get_tpu_info().vmem_capacity_bytes)
    except Exception:
        cap = 64 << 20  # conservative default, valid on every generation
    # ~8 MiB headroom for Mosaic internal scratch / semaphores; never request
    # more than ~100 MiB even on 128 MiB parts (v5e/v6e).
    return int(min(cap - (8 << 20), 100 << 20))


# --------------------------------------------------------------------------- #
# Kernel
# --------------------------------------------------------------------------- #
def gene_embedding_kernel(x_ref, w_ref, p_ref, o_ref, acc_ref, *, d_out):
    # x_ref:   (tm, tk)       input batch tile (K-slice of D_in)
    # w_ref:   (tk, D_pad)    weight K-slice (feature dim zero-padded to 128x)
    # p_ref:   (3, D_pad)     packed [bias; gamma; beta] (zero-padded)
    # o_ref:   (tm, D_pad)    output tile (padded lanes written as 0)
    # acc_ref: (tm, D_pad)    f32 accumulator scratch (persists across k)
    k = pl.program_id(1)

    @pl.when(k == 0)
    def _():
        acc_ref[...] = jnp.zeros_like(acc_ref)

    # MXU matmul with f32 accumulation; operands stay in their native dtype.
    acc_ref[...] += jnp.dot(x_ref[...], w_ref[...],
                            preferred_element_type=jnp.float32)

    @pl.when(k == pl.num_programs(1) - 1)
    def _():
        bias = p_ref[0:1, :].astype(jnp.float32)
        gamma = p_ref[1:2, :].astype(jnp.float32)
        beta = p_ref[2:3, :].astype(jnp.float32)

        # Linear bias + ReLU
        h = jnp.maximum(acc_ref[...] + bias, 0.0)

        # LayerNorm over the *real* d_out features. Padded feature lanes of h
        # are exact zeros (weight cols / bias padded with 0, ReLU(0) = 0), so
        # plain sums over D_pad already equal the sums over the real features
        # and no lane mask is needed.
        inv_d = jnp.float32(1.0 / d_out)
        mean = jnp.sum(h, axis=-1, keepdims=True) * inv_d
        ex2 = jnp.sum(h * h, axis=-1, keepdims=True) * inv_d
        var = ex2 - mean * mean
        inv_std = lax.rsqrt(var + LN_EPS)

        # Padded output lanes get 0 (gamma = beta = 0 there); the wrapper
        # slices them off.
        o_ref[...] = ((h - mean) * inv_std * gamma + beta).astype(o_ref.dtype)


# --------------------------------------------------------------------------- #
# Parameter preparation (hoisted out of the per-call hot path)
# --------------------------------------------------------------------------- #
class GeneEmbeddingParams(NamedTuple):
    weight: jax.Array    # (d_in_pad, d_pad), feature + K padded with zeros
    params: jax.Array    # (3, d_pad) rows: bias, gamma, beta (zero-padded)
    d_in: int
    d_in_pad: int
    d_out: int
    d_pad: int
    tk: int              # K tile size (== d_in_pad when not K-tiled)
    num_k: int
    vmem_budget: int


def prepare_gene_embedding_params(weight, bias, gamma, beta):
    """Pad / pack parameters once; reuse the result across calls."""
    D_in, D_out = weight.shape
    D_pad = max(_round_up(D_out, 128), 128)
    budget = _vmem_budget_bytes()
    w_item = weight.dtype.itemsize
    n_wbuf = 2  # budget assumes double-buffered weight (covers the fallback)

    # --- K (D_in) tiling decision -------------------------------------------
    # K-tile only when a fully resident weight would eat more than half the
    # VMEM budget (e.g. large D_in on v7x's 64 MiB); otherwise keep the whole
    # weight resident for the duration of the call.
    full_w_bytes = n_wbuf * D_in * D_pad * w_item
    if full_w_bytes > budget // 2 and D_in > 128:
        tk = (budget // 2) // (n_wbuf * D_pad * w_item)
        tk = max(128, (tk // 128) * 128)
        tk = min(tk, _round_up(D_in, 128))
        d_in_pad = _round_up(D_in, tk)
    else:
        tk = D_in
        d_in_pad = D_in
    num_k = d_in_pad // tk

    pad_feat = D_pad - D_out
    w_p = jnp.pad(weight, ((0, d_in_pad - D_in), (0, pad_feat)))
    params = jnp.stack([
        jnp.pad(bias, (0, pad_feat)),
        jnp.pad(gamma, (0, pad_feat)),
        jnp.pad(beta, (0, pad_feat)),
    ])
    return GeneEmbeddingParams(w_p, params, D_in, d_in_pad, D_out, D_pad,
                               tk, num_k, budget)


# --------------------------------------------------------------------------- #
# Forward pass
# --------------------------------------------------------------------------- #
def gene_embedding_prepared(x, prep: GeneEmbeddingParams):
    """x: [B, d_in] -> [B, d_out]."""
    B, D_in = x.shape
    assert D_in == prep.d_in, "input feature dim mismatch"

    x_item = x.dtype.itemsize
    w_item = prep.weight.dtype.itemsize
    p_item = prep.params.dtype.itemsize

    # --- Batch tiling: VMEM-budget-derived tm, minimal batch padding --------
    avail = int(prep.vmem_budget * 0.9)  # safety factor for accounting slack
    fixed = (2 * prep.tk * prep.d_pad * w_item          # weight (2 buffers)
             + 2 * 3 * prep.d_pad * p_item)             # packed params
    row_bytes = (2 * prep.tk * x_item                   # x tile, 2 buffers
                 + 2 * prep.d_pad * x_item              # out tile, 2 buffers
                 + prep.d_pad * 4)                      # f32 accumulator
    tm_max = (avail - fixed) // row_bytes
    tm_max = max(8, min(1024, (tm_max // 8) * 8))

    num_m = _cdiv(B, tm_max)
    # v7x has two TensorCores: keep at least 2 parallel grid steps when B
    # allows, so the "parallel" axis can be sharded across both.
    if num_m == 1 and B > 8:
        num_m = 2
    tm = _round_up(_cdiv(B, num_m), 8)
    B_pad = num_m * tm

    if B_pad != B or prep.d_in_pad != D_in:
        x = jnp.pad(x, ((0, B_pad - B), (0, prep.d_in_pad - D_in)))

    grid = (num_m, prep.num_k)
    kernel = functools.partial(gene_embedding_kernel, d_out=prep.d_out)

    x_map = lambda i, k: (i, k)
    w_map = lambda i, k: (k, 0)
    const_map = lambda i, k: (0, 0)
    out_map = lambda i, k: (i, 0)

    def build(use_buffered_hint):
        if use_buffered_hint:
            p_spec = pl.BlockSpec((3, prep.d_pad), const_map,
                                  pipeline_mode=pl.Buffered(1))
            if prep.num_k == 1:
                w_spec = pl.BlockSpec((prep.tk, prep.d_pad), w_map,
                                      pipeline_mode=pl.Buffered(1))
            else:
                w_spec = pl.BlockSpec((prep.tk, prep.d_pad), w_map)
        else:
            p_spec = pl.BlockSpec((3, prep.d_pad), const_map)
            w_spec = pl.BlockSpec((prep.tk, prep.d_pad), w_map)

        return pl.pallas_call(
            kernel,
            out_shape=jax.ShapeDtypeStruct((B_pad, prep.d_pad), x.dtype),
            grid_spec=pltpu.PrefetchScalarGridSpec(
                num_scalar_prefetch=0,
                grid=grid,
                in_specs=[
                    pl.BlockSpec((tm, prep.tk), x_map),   # x tile
                    w_spec,                               # weight K-slice
                    p_spec,                               # packed bias/gamma/beta
                ],
                out_specs=pl.BlockSpec((tm, prep.d_pad), out_map),
                scratch_shapes=[pltpu.VMEM((tm, prep.d_pad), jnp.float32)],
            ),
            compiler_params=pltpu.CompilerParams(
                dimension_semantics=("parallel", "arbitrary"),
                vmem_limit_bytes=int(prep.vmem_budget)),
        )

    try:
        out = build(True)(x, prep.weight, prep.params)
    except Exception:
        # Only disables the Buffered(1) single-buffering hint; the VMEM budget
        # above already assumes double-buffered weight/params, so this path is
        # correctly sized.
        out = build(False)(x, prep.weight, prep.params)

    return out[:B, :prep.d_out]


def gene_embedding(x, weight, bias, gamma, beta):
    """Convenience wrapper: pads params per call. Prefer prepare_* + *_prepared
    in a hot loop so the weight padding is not re-done every call."""
    prep = prepare_gene_embedding_params(weight, bias, gamma, beta)
    return gene_embedding_prepared(x, prep)


# --------------------------------------------------------------------------- #
# Reference + test
# --------------------------------------------------------------------------- #
def gene_embedding_ref(x, weight, bias, gamma, beta):
    h = x.astype(jnp.float32) @ weight.astype(jnp.float32) + bias
    h = jnp.maximum(h, 0.0)
    mean = jnp.mean(h, axis=-1, keepdims=True)
    var = jnp.mean((h - mean) ** 2, axis=-1, keepdims=True)
    return ((h - mean) * jax.lax.rsqrt(var + LN_EPS)) * gamma + beta


if __name__ == "__main__":
    key = jax.random.PRNGKey(0)
    k_x, k_w, k_b = jax.random.split(key, 3)

    B, D_in, D_out = 16, 32, 32  # small shapes: batch=16, input_dim=32, output_dim=32

    x = jax.random.normal(k_x, (B, D_in), dtype=jnp.float32)
    # Deterministic synthetic parameter init (shapes follow nn.Linear / nn.LayerNorm).
    bound = 1.0 / (D_in ** 0.5)
    weight = jax.random.uniform(k_w, (D_in, D_out), jnp.float32, -bound, bound)
    bias = jax.random.uniform(k_b, (D_out,), jnp.float32, -bound, bound)
    gamma = jnp.ones((D_out,), jnp.float32)   # LayerNorm weight init
    beta = jnp.zeros((D_out,), jnp.float32)   # LayerNorm bias init

    prep = prepare_gene_embedding_params(weight, bias, gamma, beta)  # pad once
    out = gene_embedding_prepared(x, prep)
    out = jax.block_until_ready(out)

    ref = gene_embedding_ref(x, weight, bias, gamma, beta)
    assert out.shape == (B, D_out)
    assert jnp.allclose(out, ref, atol=2e-5, rtol=1e-5), "mismatch vs reference"

    print("KERNEL_OK")
</pallas_src>

<mosaic_0001>
module attributes {stable_mosaic.version = 11 : i64} {
  func.func @gene_embedding_kernel(%arg0: i32, %arg1: i32, %arg2: memref<8x32xf32, #tpu.memory_space<vmem>>, %arg3: memref<32x128xf32, #tpu.memory_space<vmem>>, %arg4: memref<3x128xf32, #tpu.memory_space<vmem>>, %arg5: memref<8x128xf32, #tpu.memory_space<vmem>>, %arg6: memref<8x128xf32, #tpu.memory_space<vmem>>) attributes {dimension_semantics = [#tpu.dimension_semantics<parallel>, #tpu.dimension_semantics<arbitrary>], iteration_bounds = array<i64: 2, 1>, scalar_prefetch = 0 : i64, scratch_operands = 1 : i64, tpu.core_type = #tpu.core_type<tc>, window_params = [{transform_indices = @transform_0, window_bounds = array<i64: 8, 32>}, {pipeline_mode = #tpu.pipeline_mode<synchronous>, transform_indices = @transform_1, window_bounds = array<i64: 32, 128>}, {pipeline_mode = #tpu.pipeline_mode<synchronous>, transform_indices = @transform_2, window_bounds = array<i64: 3, 128>}, {transform_indices = @transform_3, window_bounds = array<i64: 8, 128>}]} {
    %c0_i32 = arith.constant 0 : i32
    %0 = arith.cmpi eq, %arg1, %c0_i32 : i32
    %1 = arith.extui %0 : i1 to i32
    %c0_i32_0 = arith.constant 0 : i32
    %2 = arith.cmpi ne, %1, %c0_i32_0 : i32
    scf.if %2 {
      %cst_10 = arith.constant 0.000000e+00 : f32
      %12 = vector.broadcast %cst_10 : f32 to vector<8x128xf32>
      %c0_11 = arith.constant 0 : index
      %c0_12 = arith.constant 0 : index
      %13 = vector.load %arg6[%c0_11, %c0_12] : memref<8x128xf32, #tpu.memory_space<vmem>>, vector<8x128xf32>
      tpu.vector_store %arg6[%c0_11, %c0_12], %12 {strides = array<i32>} : memref<8x128xf32, #tpu.memory_space<vmem>>, vector<8x128xf32>,
    } else {
    }
    %c0 = arith.constant 0 : index
    %c0_1 = arith.constant 0 : index
    %3 = vector.load %arg6[%c0, %c0_1] : memref<8x128xf32, #tpu.memory_space<vmem>>, vector<8x128xf32>
    %c0_2 = arith.constant 0 : index
    %c0_3 = arith.constant 0 : index
    %4 = vector.load %arg2[%c0_2, %c0_3] : memref<8x32xf32, #tpu.memory_space<vmem>>, vector<8x32xf32>
    %c0_4 = arith.constant 0 : index
    %c0_5 = arith.constant 0 : index
    %5 = vector.load %arg3[%c0_4, %c0_5] : memref<32x128xf32, #tpu.memory_space<vmem>>, vector<32x128xf32>
    %cst = arith.constant dense<0.000000e+00> : vector<8x128xf32>
    %6 = tpu.matmul %4, %5, %cst {dimension_numbers = #tpu.dot_dimension_numbers<[1], [0], [0], [1], [0, 0, 1, 1], [], []>} : vector<8x32xf32>, vector<32x128xf32>, vector<8x128xf32> -> vector<8x128xf32>
    %7 = arith.addf %3, %6 : vector<8x128xf32>
    %c0_6 = arith.constant 0 : index
    %c0_7 = arith.constant 0 : index
    %8 = vector.load %arg6[%c0_6, %c0_7] : memref<8x128xf32, #tpu.memory_space<vmem>>, vector<8x128xf32>
    tpu.vector_store %arg6[%c0_6, %c0_7], %7 {strides = array<i32>} : memref<8x128xf32, #tpu.memory_space<vmem>>, vector<8x128xf32>,
    %c0_i32_8 = arith.constant 0 : i32
    %9 = arith.cmpi eq, %arg1, %c0_i32_8 : i32
    %10 = arith.extui %9 : i1 to i32
    %c0_i32_9 = arith.constant 0 : i32
    %11 = arith.cmpi ne, %10, %c0_i32_9 : i32
    scf.if %11 {
      %c0_10 = arith.constant 0 : index
      %c0_11 = arith.constant 0 : index
      %12 = vector.load %arg4[%c0_10, %c0_11] : memref<3x128xf32, #tpu.memory_space<vmem>>, vector<1x128xf32>
      %c1 = arith.constant 1 : index
      %c0_12 = arith.constant 0 : index
      %13 = vector.load %arg4[%c1, %c0_12] : memref<3x128xf32, #tpu.memory_space<vmem>>, vector<1x128xf32>
      %c2 = arith.constant 2 : index
      %c0_13 = arith.constant 0 : index
      %14 = vector.load %arg4[%c2, %c0_13] : memref<3x128xf32, #tpu.memory_space<vmem>>, vector<1x128xf32>
      %c0_14 = arith.constant 0 : index
      %c0_15 = arith.constant 0 : index
      %15 = vector.load %arg6[%c0_14, %c0_15] : memref<8x128xf32, #tpu.memory_space<vmem>>, vector<8x128xf32>
      %16 = vector.broadcast %12 : vector<1x128xf32> to vector<8x128xf32>
      %17 = arith.addf %15, %16 : vector<8x128xf32>
      %cst_16 = arith.constant 0.000000e+00 : f32
      %18 = vector.broadcast %cst_16 : f32 to vector<8x128xf32>
      %19 = arith.maximumf %17, %18 : vector<8x128xf32>
      %cst_17 = arith.constant dense<0.000000e+00> : vector<8xf32>
      %20 = vector.multi_reduction <add>, %19, %cst_17 [1] : vector<8x128xf32> to vector<8xf32>
      %21 = vector.shape_cast %20 : vector<8xf32> to vector<8x1xf32>
      %cst_18 = arith.constant 3.125000e-02 : f32
      %22 = vector.broadcast %cst_18 : f32 to vector<8x1xf32>
      %23 = arith.mulf %21, %22 : vector<8x1xf32>
      %24 = arith.mulf %19, %19 : vector<8x128xf32>
      %cst_19 = arith.constant dense<0.000000e+00> : vector<8xf32>
      %25 = vector.multi_reduction <add>, %24, %cst_19 [1] : vector<8x128xf32> to vector<8xf32>
      %26 = vector.shape_cast %25 : vector<8xf32> to vector<8x1xf32>
      %cst_20 = arith.constant 3.125000e-02 : f32
      %27 = vector.broadcast %cst_20 : f32 to vector<8x1xf32>
      %28 = arith.mulf %26, %27 : vector<8x1xf32>
      %29 = arith.mulf %23, %23 : vector<8x1xf32>
      %30 = arith.subf %28, %29 : vector<8x1xf32>
      %cst_21 = arith.constant 9.99999974E-6 : f32
      %31 = vector.broadcast %cst_21 : f32 to vector<8x1xf32>
      %32 = arith.addf %30, %31 : vector<8x1xf32>
      %33 = math.rsqrt %32 : vector<8x1xf32>
      %34 = vector.broadcast %23 : vector<8x1xf32> to vector<8x128xf32>
      %35 = arith.subf %19, %34 : vector<8x128xf32>
      %36 = vector.broadcast %33 : vector<8x1xf32> to vector<8x128xf32>
      %37 = arith.mulf %35, %36 : vector<8x128xf32>
      %38 = vector.broadcast %13 : vector<1x128xf32> to vector<8x128xf32>
      %39 = arith.mulf %37, %38 : vector<8x128xf32>
      %40 = vector.broadcast %14 : vector<1x128xf32> to vector<8x128xf32>
      %41 = arith.addf %39, %40 : vector<8x128xf32>
      %c0_22 = arith.constant 0 : index
      %c0_23 = arith.constant 0 : index
      %42 = vector.load %arg5[%c0_22, %c0_23] : memref<8x128xf32, #tpu.memory_space<vmem>>, vector<8x128xf32>
      tpu.vector_store %arg5[%c0_22, %c0_23], %41 {strides = array<i32>} : memref<8x128xf32, #tpu.memory_space<vmem>>, vector<8x128xf32>,
    } else {
    }
    return
  }
  func.func @transform_0(%arg0: i32, %arg1: i32) -> (i32, i32) {
    %c0_i32 = arith.constant 0 : i32
    return %arg0, %arg1 : i32, i32
  }
  func.func @transform_1(%arg0: i32, %arg1: i32) -> (i32, i32) {
    %c0_i32 = arith.constant 0 : i32
    %c0_i32_0 = arith.constant 0 : i32
    return %arg1, %c0_i32 : i32, i32
  }
  func.func @transform_2(%arg0: i32, %arg1: i32) -> (i32, i32) {
    %c0_i32 = arith.constant 0 : i32
    %c0_i32_0 = arith.constant 0 : i32
    %c0_i32_1 = arith.constant 0 : i32
    return %c0_i32, %c0_i32_0 : i32, i32
  }
  func.func @transform_3(%arg0: i32, %arg1: i32) -> (i32, i32) {
    %c0_i32 = arith.constant 0 : i32
    %c0_i32_0 = arith.constant 0 : i32
    return %arg0, %c0_i32 : i32, i32
  }
}

module attributes {stable_mosaic.version = 11 : i64} {
  func.func @gene_embedding_kernel(%arg0: i32, %arg1: i32, %arg2: memref<8x32xf32, #tpu.memory_space<vmem>>, %arg3: memref<32x128xf32, #tpu.memory_space<vmem>>, %arg4: memref<3x128xf32, #tpu.memory_space<vmem>>, %arg5: memref<8x128xf32, #tpu.memory_space<vmem>>, %arg6: memref<8x128xf32, #tpu.memory_space<vmem>>) attributes {dimension_semantics = [#tpu.dimension_semantics<parallel>, #tpu.dimension_semantics<arbitrary>], iteration_bounds = array<i64: 2, 1>, scalar_prefetch = 0 : i64, scratch_operands = 1 : i64, tpu.core_type = #tpu.core_type<tc>, window_params = [{transform_indices = @transform_0, window_bounds = array<i64: 8, 32>}, {transform_indices = @transform_1, window_bounds = array<i64: 32, 128>}, {pipeline_mode = #tpu.pipeline_mode<synchronous>, transform_indices = @transform_2, window_bounds = array<i64: 3, 128>}, {transform_indices = @transform_3, window_bounds = array<i64: 8, 128>}]} {
    %c0_i32 = arith.constant 0 : i32
    %0 = arith.cmpi eq, %arg1, %c0_i32 : i32
    %1 = arith.extui %0 : i1 to i32
    %c0_i32_0 = arith.constant 0 : i32
    %2 = arith.cmpi ne, %1, %c0_i32_0 : i32
    scf.if %2 {
      %cst_10 = arith.constant 0.000000e+00 : f32
      %12 = vector.broadcast %cst_10 : f32 to vector<8x128xf32>
      %c0_11 = arith.constant 0 : index
      %c0_12 = arith.constant 0 : index
      %13 = vector.load %arg6[%c0_11, %c0_12] : memref<8x128xf32, #tpu.memory_space<vmem>>, vector<8x128xf32>
      tpu.vector_store %arg6[%c0_11, %c0_12], %12 {strides = array<i32>} : memref<8x128xf32, #tpu.memory_space<vmem>>, vector<8x128xf32>,
    } else {
    }
    %c0 = arith.constant 0 : index
    %c0_1 = arith.constant 0 : index
    %3 = vector.load %arg6[%c0, %c0_1] : memref<8x128xf32, #tpu.memory_space<vmem>>, vector<8x128xf32>
    %c0_2 = arith.constant 0 : index
    %c0_3 = arith.constant 0 : index
    %4 = vector.load %arg2[%c0_2, %c0_3] : memref<8x32xf32, #tpu.memory_space<vmem>>, vector<8x32xf32>
    %c0_4 = arith.constant 0 : index
    %c0_5 = arith.constant 0 : index
    %5 = vector.load %arg3[%c0_4, %c0_5] : memref<32x128xf32, #tpu.memory_space<vmem>>, vector<32x128xf32>
    %cst = arith.constant dense<0.000000e+00> : vector<8x128xf32>
    %6 = tpu.matmul %4, %5, %cst {dimension_numbers = #tpu.dot_dimension_numbers<[1], [0], [0], [1], [0, 0, 1, 1], [], []>} : vector<8x32xf32>, vector<32x128xf32>, vector<8x128xf32> -> vector<8x128xf32>
    %7 = arith.addf %3, %6 : vector<8x128xf32>
    %c0_6 = arith.constant 0 : index
    %c0_7 = arith.constant 0 : index
    %8 = vector.load %arg6[%c0_6, %c0_7] : memref<8x128xf32, #tpu.memory_space<vmem>>, vector<8x128xf32>
    tpu.vector_store %arg6[%c0_6, %c0_7], %7 {strides = array<i32>} : memref<8x128xf32, #tpu.memory_space<vmem>>, vector<8x128xf32>,
    %c0_i32_8 = arith.constant 0 : i32
    %9 = arith.cmpi eq, %arg1, %c0_i32_8 : i32
    %10 = arith.extui %9 : i1 to i32
    %c0_i32_9 = arith.constant 0 : i32
    %11 = arith.cmpi ne, %10, %c0_i32_9 : i32
    scf.if %11 {
      %c0_10 = arith.constant 0 : index
      %c0_11 = arith.constant 0 : index
      %12 = vector.load %arg4[%c0_10, %c0_11] : memref<3x128xf32, #tpu.memory_space<vmem>>, vector<1x128xf32>
      %c1 = arith.constant 1 : index
      %c0_12 = arith.constant 0 : index
      %13 = vector.load %arg4[%c1, %c0_12] : memref<3x128xf32, #tpu.memory_space<vmem>>, vector<1x128xf32>
      %c2 = arith.constant 2 : index
      %c0_13 = arith.constant 0 : index
      %14 = vector.load %arg4[%c2, %c0_13] : memref<3x128xf32, #tpu.memory_space<vmem>>, vector<1x128xf32>
      %c0_14 = arith.constant 0 : index
      %c0_15 = arith.constant 0 : index
      %15 = vector.load %arg6[%c0_14, %c0_15] : memref<8x128xf32, #tpu.memory_space<vmem>>, vector<8x128xf32>
      %16 = vector.broadcast %12 : vector<1x128xf32> to vector<8x128xf32>
      %17 = arith.addf %15, %16 : vector<8x128xf32>
      %cst_16 = arith.constant 0.000000e+00 : f32
      %18 = vector.broadcast %cst_16 : f32 to vector<8x128xf32>
      %19 = arith.maximumf %17, %18 : vector<8x128xf32>
      %cst_17 = arith.constant dense<0.000000e+00> : vector<8xf32>
      %20 = vector.multi_reduction <add>, %19, %cst_17 [1] : vector<8x128xf32> to vector<8xf32>
      %21 = vector.shape_cast %20 : vector<8xf32> to vector<8x1xf32>
      %cst_18 = arith.constant 3.125000e-02 : f32
      %22 = vector.broadcast %cst_18 : f32 to vector<8x1xf32>
      %23 = arith.mulf %21, %22 : vector<8x1xf32>
      %24 = arith.mulf %19, %19 : vector<8x128xf32>
      %cst_19 = arith.constant dense<0.000000e+00> : vector<8xf32>
      %25 = vector.multi_reduction <add>, %24, %cst_19 [1] : vector<8x128xf32> to vector<8xf32>
      %26 = vector.shape_cast %25 : vector<8xf32> to vector<8x1xf32>
      %cst_20 = arith.constant 3.125000e-02 : f32
      %27 = vector.broadcast %cst_20 : f32 to vector<8x1xf32>
      %28 = arith.mulf %26, %27 : vector<8x1xf32>
      %29 = arith.mulf %23, %23 : vector<8x1xf32>
      %30 = arith.subf %28, %29 : vector<8x1xf32>
      %cst_21 = arith.constant 9.99999974E-6 : f32
      %31 = vector.broadcast %cst_21 : f32 to vector<8x1xf32>
      %32 = arith.addf %30, %31 : vector<8x1xf32>
      %33 = math.rsqrt %32 : vector<8x1xf32>
      %34 = vector.broadcast %23 : vector<8x1xf32> to vector<8x128xf32>
      %35 = arith.subf %19, %34 : vector<8x128xf32>
      %36 = vector.broadcast %33 : vector<8x1xf32> to vector<8x128xf32>
      %37 = arith.mulf %35, %36 : vector<8x128xf32>
      %38 = vector.broadcast %13 : vector<1x128xf32> to vector<8x128xf32>
      %39 = arith.mulf %37, %38 : vector<8x128xf32>
      %40 = vector.broadcast %14 : vector<1x128xf32> to vector<8x128xf32>
      %41 = arith.addf %39, %40 : vector<8x128xf32>
      %c0_22 = arith.constant 0 : index
      %c0_23 = arith.constant 0 : index
      %42 = vector.load %arg5[%c0_22, %c0_23] : memref<8x128xf32, #tpu.memory_space<vmem>>, vector<8x128xf32>
      tpu.vector_store %arg5[%c0_22, %c0_23], %41 {strides = array<i32>} : memref<8x128xf32, #tpu.memory_space<vmem>>, vector<8x128xf32>,
    } else {
    }
    return
  }
  func.func @transform_0(%arg0: i32, %arg1: i32) -> (i32, i32) {
    %c0_i32 = arith.constant 0 : i32
    return %arg0, %arg1 : i32, i32
  }
  func.func @transform_1(%arg0: i32, %arg1: i32) -> (i32, i32) {
    %c0_i32 = arith.constant 0 : i32
    %c0_i32_0 = arith.constant 0 : i32
    return %arg1, %c0_i32 : i32, i32
  }
  func.func @transform_2(%arg0: i32, %arg1: i32) -> (i32, i32) {
    %c0_i32 = arith.constant 0 : i32
    %c0_i32_0 = arith.constant 0 : i32
    %c0_i32_1 = arith.constant 0 : i32
    return %c0_i32, %c0_i32_0 : i32, i32
  }
  func.func @transform_3(%arg0: i32, %arg1: i32) -> (i32, i32) {
    %c0_i32 = arith.constant 0 : i32
    %c0_i32_0 = arith.constant 0 : i32
    return %arg0, %c0_i32 : i32, i32
  }
}

</mosaic_0001>

<bundles_post_ra>
// kernel: tpu_custom_call.1
= control target key start
LH: loop header
LB: loop body
LE: loop exit
PB: predicated region body
PF: predicated region fallthrough
CT: control target
= control target key end

     0   :  { %8 = vsyncpa [#allocation4], 0  ;;  %s973_s0 = inlined_call_operand.hbm [shape: f32[16,32], index: 0, kind: input, shape index: {}]   ;;  %s974_s1 = inlined_call_operand.hbm [shape: f32[32,128], index: 1, kind: input, shape index: {}]   ;;  %s975_s2 = inlined_call_operand.hbm [shape: f32[3,128], index: 2, kind: input, shape index: {}]   ;;  %s976_s3 = inlined_call_operand.hbm [shape: f32[16,128], index: 3, kind: output, shape index: {}]  }
   0x1   :  { %10 = vsyncpa [#allocation4 + $0x1], 0 }
   0x2   :  { %11 = vsyncpa [#allocation7], 0 }
   0x3   :  { %12 = vsyncpa [#allocation5], 0 }
   0x4   :  { %14 = vsyncpa [#allocation5 + $0x1], 0  ;;  %s795_s12 = smov 0   ;;  %s797_s13 = smov 0  }
   0x5   :  { %s799_s14 = smov 0   ;;  %s801_s15 = smov 0  }
   0x6   :  { %s803_s16 = smov 0   ;;  %s805_s17 = smov 0  }
   0x7 LB: > { %s475_s18 = sadd.s32 4294967295, %s765_s17   ;;  %s476_s19 = sadd.s32 4294967294, %s765_s17   ;;  %s765_s17 = sphi %s805_s17, %s20_s17   ;;  %s761_s16 = sphi %s803_s16, %s996_s16   ;;  %s757_s15 = sphi %s801_s15, %s995_s15   ;;  %s753_s14 = sphi %s799_s14, %s994_s14   ;;  %s749_s13 = sphi %s797_s13, %s993_s13   ;;  %s745_s12 = sphi %s795_s12, %s992_s12  }
   0x8   : > { %p54_p0 = scmp.ne.s32.totalorder %s749_s13, %s745_s12  ;;  %p829_p1 = scmp.eq.s32.totalorder %s475_s18, 0 }
   0x9   : > { %p833_p2 = scmp.eq.s32.totalorder %s475_s18, 1  ;;  %p131_p3 = scmp.eq.s32.totalorder %s476_s19, 1 }
   0xa   : > { %s980_s20 = scalar_select %p829_p1, 1, 0 }
   0xb   : > { %p839_p4 = por %p829_p1, %p54_p0  ;;  %p477_p5 = scmp.ge.s32.totalorder %s765_s17, 1 }
   0xc   : > { %p844_p6 = por %p131_p3, %p54_p0  ;;  %p138_p7 = scmp.lt.s32.totalorder %s765_s17, 3 }
   0xd   : > { %s982_s22 = scalar_select %p839_p4, 1, 0 }
   0xe   : > { %s983_s23 = scalar_select %p844_p6, 1, 0 }
   0xf   : > { %p849_p8 = pnand %p477_p5, %p138_p7  ;;  %s767_s25 = smov [#allocation6]  }
  0x10   : > { %s153_s26 = sshll.u32 %s767_s25, 4  ;;  %s768_s28 = smov [#allocation8]   ;;  %s154_s26 = int_to_ptr.vmem [resolvable:$true] %s153_s26 }
  0x11   : > { %p524_p9 = pneg %p849_p8  ;;  %s167_s29 = sshll.u32 %s768_s28, 4  ;;  %s168_s29 = int_to_ptr.vmem [resolvable:$true] %s167_s29 }
  0x12   : > { %s612_s30 = scalar_lea.vmem %s154_s26, 512  ;;  %p620_p5 = scmp.lt.s32.totalorder %s154_s26, %s154_s26 }
  0x13   : > { %p858_p11 = pnand %p524_p9, %p829_p1  ;;  %p613_p13 = scmp.ne.s32.totalorder %s154_s26, %s612_s30 }
  0x14   : > { %p621_p7 = scmp.lt.s32.totalorder %s612_s30, %s612_s30 }
  0x15   : > { %p603_p12 = pneg %p858_p11 }
  0x16   : > { %p622_p10 = por %p621_p7, %p620_p5 }
  0x17   : > { %p615_p0 = pnand %p613_p13, %p603_p12 }
  0x19   : > { %p616_p3 = pneg %p615_p0 }
  0x1b   : > { %p623_p9 = pnand %p622_p10, %p616_p3 }
  0x1d   : > { %626 = shalt.err (!%p623_p9)
}
  0x1e   : > { %s769_s4 = smov 128   ;;  %s770_s5 = smov 8  }
  0x1f   : > { %527 = dma.hbm_to_vmem [thread:$0]  (!%p858_p11), %s974_s1, 512, %s154_s26, [#allocation7], %s769_s4, %s769_s4, %s770_s5  }
  0x20   : > { %s638_s8 = scalar_lea.vmem %s168_s29, 64  ;;  %p646_p1 = scmp.lt.s32.totalorder %s168_s29, %s168_s29 }
  0x21   : > { %p639_p6 = scmp.ne.s32.totalorder %s168_s29, %s638_s8  ;;  %p647_p4 = scmp.lt.s32.totalorder %s638_s8, %s638_s8 }
  0x23   : > { %p641_p13 = pnand %p639_p6, %p603_p12  ;;  %p648_p5 = por %p647_p4, %p646_p1 }
  0x25   : > { %p642_p0 = pneg %p641_p13 }
  0x27   : > { %p649_p10 = pnand %p648_p5, %p642_p0 }
  0x29   : > { %652 = shalt.err (!%p649_p10)
}
  0x2a   : > { %530 = dma.hbm_to_vmem [thread:$0]  (!%p858_p11), %s975_s2, 64, %s168_s29, [#allocation7]  }
  0x2b   : > { %s32_s11 = sadd.s32 1, %s761_s16  ;;  %s41_s18 = sadd.s32 1, %s753_s14 }
  0x2c   : > { %p34_p1 = scmp.ge.s32.totalorder %s32_s11, 2  ;;  %p48_p4 = scmp.ne.s32.totalorder %s753_s14, %s749_s13 }
  0x2d   : > { %p49_p6 = scmp.eq.s32.totalorder %s765_s17, 0  ;;  %p541_p12 = scmp.lt.s32.totalorder %s765_s17, 2 }
  0x2e   : > { %s998_s11 = smov (%p34_p1, %s32_s11), 0  ;;  %p890_p7 = por %p833_p2, %p48_p4 }
  0x2f   : > { %p50_p3 = por %p49_p6, %p48_p4  ;;  %s36_s25 = ssub.s32 %s761_s16, %s998_s11 }
  0x30   : > { %s178_s26 = sand.u32 1, %s753_s14   ;;  %p39_p9 = scmp.eq.s32.totalorder %s36_s25, 0 }
  0x31   : > { %s481_s27 = sshll.u32 %s178_s26, 3  ;;  %s482_s28 = sshll.u32 %s761_s16, 7 }
  0x32   : > { %s899_s29 = scalar_select %p39_p9, %s753_s14, %s41_s18  }
  0x33   : > { %s188_s5 = scalar_lea.hbm %s973_s0, %s482_s28  ;;  %s182_s6 = scalar_lea.vmem [#allocation3], %s481_s27 }
  0x34   : > { %s190_s7 = sshll.u32 %s182_s6, 4  ;;  %p906_p11 = pnand %p541_p12, %p50_p3  ;;  %s191_s7 = int_to_ptr.vmem [resolvable:$true] %s190_s7 }
  0x35   : > { %s179_s8 = scalar_lea.sflag [#allocation4], %s178_s26  ;;  %s666_s9 = scalar_lea.vmem %s191_s7, 128 }
  0x36   : > { %p655_p2 = pneg %p906_p11  ;;  %p667_p13 = scmp.ne.s32.totalorder %s191_s7, %s666_s9 }
  0x37   : > { %s771_s10 = smov [#allocation3]  }
  0x38   : > { %p669_p0 = pnand %p667_p13, %p655_p2  ;;  %s671_s18 = sshll.u32 %s771_s10, 4  ;;  %s672_s18 = int_to_ptr.vmem [resolvable:$false] %s671_s18 }
  0x39   : > { %s673_s25 = scalar_lea.vmem %s672_s18, 256  ;;  %p674_p10 = scmp.lt.s32.totalorder %s191_s7, %s672_s18 }
  0x3a   : > { %p670_p5 = pneg %p669_p0  ;;  %p675_p1 = scmp.lt.s32.totalorder %s673_s25, %s666_s9 }
  0x3c   : > { %p676_p4 = por %p675_p1, %p674_p10 }
  0x3e   : > { %p677_p6 = pnand %p676_p4, %p670_p5 }
  0x40   : > { %680 = shalt.err (!%p677_p6)
}
  0x41   : > { %534 = dma.hbm_to_vmem [thread:$0]  (!%p906_p11), %s188_s5, 128, %s191_s7, %s179_s8  }
  0x42   : > { %199 = sbr.rel (%p849_p8) target bundleno = 462 (0x1ce), region = 32  ;;  %s917_s26 = sand.u32 (!%p849_p8), 1, %s749_s13  }
  0x43   : > { %s484_s27 = sshll.u32 (!%p849_p8), %s917_s26, 3  ;;  %s202_s28 = scalar_lea.sflag (!%p849_p8), [#allocation4], %s917_s26 }
  0x44   : > { %s205_s30 = scalar_lea.vmem (!%p849_p8), [#allocation3], %s484_s27  ;;  %p988_p12 = scmp.ne.s32.totalorder (!%p849_p8), %s982_s22, 0 }
  0x47   : > { %732 = dma.done.wait (%p988_p12), %s202_s28, 128  }
  0x48   : > { %734 = vsyncadd (%p988_p12), %s202_s28, 4294967168  ;;  %p989_p3 = scmp.ne.s32.totalorder %s980_s20, 0 }
  0x4a   : > { %736 = dma.done.wait (%p989_p3), [#allocation7], 576  }
  0x4b   : > { %738 = vsyncadd (%p989_p3), [#allocation7], 4294966720  ;;  %v772_v0 = vmov 0.0   ;;  %vm773_vm0 = vmmov 0   ;;  %v247_v1 = vld [vmem:[#allocation6 + $0x18] sm:$0xff]  ;;  %v246_v2 = vld [vmem:[#allocation6 + $0x10] sm:$0xff] }
  0x4c   : > { %501 = vmatprep.subr.mxu0 %v772_v0  ;;  %509 = vmatprep.mubr.msk.f32.mxu0 %vm773_vm0, %v772_v0  ;;  %v245_v3 = vld [vmem:[#allocation6 + $0x8] sm:$0xff]  ;;  %v244_v4 = vld [vmem:[#allocation6] sm:$0xff]  ;;  %v243_v5 = vld [vmem:[%s205_s30] sm:$0xff]  ;;  %vm248_vm1 = vcmask 261120   ;;  %s493_s20 = sshll.u32 %s757_s15, 7  ;;  %s235_s22 = scalar_lea.vmem [#allocation9], %s484_s27 }
  0x4d   : > { %502 = vmatpush3.msra.mxu0 %v247_v1  ;;  %v489_v6 = vld [vmem:[#allocation8] ss:$0 sm:$0xff]  ;;  %v490_v21 = vld [vmem:[#allocation8 + $0x1] ss:$0 sm:$0xff]  ;;  %v491_v23 = vld [vmem:[#allocation8 + $0x2] ss:$0 sm:$0xff]  ;;  %s373_s6 = scalar_lea.hbm %s976_s3, %s493_s20 }
  0x4e   : > { %503 = vmatprep.subr.mxu0 %v772_v0  ;;  %s375_s24 = sshll.u32 %s235_s22, 4  ;;  %s362_s7 = scalar_lea.sflag [#allocation5], %s917_s26  ;;  %s376_s24 = int_to_ptr.vmem [resolvable:$true] %s375_s24 }
  0x4f   : > { %504 = vmatpush3.msra.mxu0 %v246_v2  ;;  %s681_s21 = scalar_lea.vmem %s376_s24, 128  ;;  %s774_s8 = smov [#allocation9]  }
  0x50   : > { %505 = vmatprep.subr.mxu0 %v772_v0  ;;  %p682_p8 = scmp.ne.s32.totalorder %s376_s24, %s681_s21  ;;  %s685_s9 = sshll.u32 %s774_s8, 4  ;;  %s686_s9 = int_to_ptr.vmem [resolvable:$false] %s685_s9 }
  0x51   : > { %506 = vmatpush3.msra.mxu0 %v245_v3  ;;  %s687_s15 = scalar_lea.vmem %s686_s9, 256  ;;  %p688_p2 = scmp.lt.s32.totalorder %s376_s24, %s686_s9 }
  0x52   : > { %507 = vmatprep.subr.mxu0 %v772_v0  ;;  %p683_p9 = pnand %p682_p8, %p890_p7  ;;  %p689_p13 = scmp.lt.s32.totalorder %s687_s15, %s681_s21 }
  0x53   : > { %508 = vmatpush3.msra.mxu0 %v244_v4 }
  0x54   : > { %510 = vmatmul.mubr.msk.f32.vlgmr.msra.gmra.mxu0 %vm248_vm1, %v243_v5  ;;  %p684_p11 = pneg %p683_p9  ;;  %p690_p0 = por %p689_p13, %p688_p2 }
  0x56   : > { %p691_p5 = pnand %p690_p0, %p684_p11 }
 0x114   : > { %v318_v7 = vpop.f32.mrf.mxu0 }
 0x115   : > { %v335_v8 = vadd.f32 %v489_v6, %v318_v7 }
 0x116   : > { %v511_v9 = vpop.f32.mrf.mxu0 }
 0x117   : > { %v336_v10 = vmax.f32 %v335_v8, 0.0 }
 0x119   : > { %337 = vadd.xlane.f32.xlu0 %v336_v10  ;;  %v340_v11 = vmul.f32 %v336_v10, %v336_v10 }
 0x11d   : > { %341 = vadd.xlane.f32.xlu0 %v340_v11 }
 0x1a2   : > { %v338_v12 = vpop.xlane.xlu0 %337 }
 0x1a3   : > { %v339_v13 = vmul.f32 0.03125, %v338_v12 }
 0x1a5   : > { %v344_v15 = vmul.f32 %v339_v13, %v339_v13  ;;  %v348_v19 = vsub.f32 %v336_v10, %v339_v13 }
 0x1a6   : > { %v342_v14 = vpop.xlane.xlu0 %341 }
 0x1a7   : > { %v343_v16 = vmul.f32 0.03125, %v342_v14 }
 0x1a9   : > { %v345_v17 = vsub.f32 %v343_v16, %v344_v15 }
 0x1ab   : > { %v346_v18 = vadd.f32 1e-05, %v345_v17 }
 0x1ad   : > { %599 = vrsqrt.f32 %v346_v18 }
 0x1ba   : > { %v600_v20 = vpop.eup %599 }
 0x1bb   : > { %v349_v22 = vmul.f32 %v600_v20, %v348_v19 }
 0x1bd   : > { %v354_v24 = vmul.f32 %v490_v21, %v349_v22 }
 0x1bf   : > { %v359_v25 = vadd.f32 %v491_v23, %v354_v24 }
 0x1c1   : > { %360 = vst [vmem:[%s235_s22] sm:$0xff] %v359_v25 }
 0x1c2   : > { %694 = shalt.err (!%p691_p5)
}
 0x1c3   : > { %s695_s10 = scalar_lea.hbm %s373_s6, 128  ;;  %s699_s26 = scalar_lea.hbm %s976_s3, 256 }
 0x1c4   : > { %p696_p10 = scmp.ne.s32.totalorder %s373_s6, %s695_s10  ;;  %p700_p6 = scmp.lt.s32.totalorder %s373_s6, %s976_s3 }
 0x1c5   : > { %p701_p12 = scmp.lt.s32.totalorder %s699_s26, %s695_s10 }
 0x1c6   : > { %p697_p1 = pnand %p696_p10, %p890_p7 }
 0x1c7   : > { %p702_p3 = por %p701_p12, %p700_p6 }
 0x1c8   : > { %p698_p4 = pneg %p697_p1 }
 0x1ca   : > { %p703_p8 = pnand %p702_p3, %p698_p4 }
 0x1cc   : > { %706 = shalt.err (!%p703_p8)
}
 0x1cd   : > { %522 = dma.vmem_to_hbm [thread:$0]  (%p890_p7), %s376_s24, 128, %s373_s6, %s362_s7  }
 0x1ce PF: > { %s387_s30 = sand.u32 1, %s745_s12   ;;  %p990_p9 = scmp.ne.s32.totalorder %s983_s23, 0 }
 0x1cf   : > { %p991_p11 = scmp.ge.s32.totalorder %s765_s17, 2  ;;  %s388_s20 = scalar_lea.sflag [#allocation5], %s387_s30 }
 0x1d1   : > { %p536_p2 = pnand %p991_p11, %p990_p9 }
 0x1d3   : > { %p537_p13 = pneg %p536_p2 }
 0x1d5   : > { %740 = dma.done.wait (%p537_p13), %s388_s20, 128  }
 0x1d6   : > { %742 = vsyncadd (%p537_p13), %s388_s20, 4294967168  ;;  %s20_s17 = sadd.s32 1, %s765_s17   ;;  %s992_s12 = smov %s749_s13 }
 0x1d7   : > { %p17_p0 = scmp.ge.s32.totalorder %s20_s17, 4   ;;  %s993_s13 = smov %s753_s14 }
 0x1d8   : > { %s994_s14 = smov %s899_s29  ;;  %s995_s15 = smov %s761_s16 }
 0x1d9   : > { %s996_s16 = smov %s998_s11  ;;  %19 = sbr.rel (!%p17_p0) target bundleno = 7 (0x7), region = 94 }
 0x1de   :  { %393 = vsyncpa [#allocation4], 1 }
 0x1df   :  { %395 = vsyncpa [#allocation4 + $0x1], 1 }
 0x1e0   :  { %396 = vsyncpa [#allocation7], 1 }
 0x1e1   :  { %397 = vsyncpa [#allocation5], 1 }
 0x1e2   :  { %399 = vsyncpa [#allocation5 + $0x1], 1 }

// kernel: tpu_custom_call.1
= control target key start
LH: loop header
LB: loop body
LE: loop exit
PB: predicated region body
PF: predicated region fallthrough
CT: control target
= control target key end

     0   :  { %8 = vsyncpa [#allocation4], 0  ;;  %s973_s0 = inlined_call_operand.hbm [shape: f32[16,32], index: 0, kind: input, shape index: {}]   ;;  %s974_s1 = inlined_call_operand.hbm [shape: f32[32,128], index: 1, kind: input, shape index: {}]   ;;  %s975_s2 = inlined_call_operand.hbm [shape: f32[3,128], index: 2, kind: input, shape index: {}]   ;;  %s976_s3 = inlined_call_operand.hbm [shape: f32[16,128], index: 3, kind: output, shape index: {}]  }
   0x1   :  { %10 = vsyncpa [#allocation4 + $0x1], 0 }
   0x2   :  { %11 = vsyncpa [#allocation7], 0 }
   0x3   :  { %12 = vsyncpa [#allocation5], 0 }
   0x4   :  { %14 = vsyncpa [#allocation5 + $0x1], 0  ;;  %s795_s12 = smov 0   ;;  %s797_s13 = smov 0  }
   0x5   :  { %s799_s14 = smov 0   ;;  %s801_s15 = smov 0  }
   0x6   :  { %s803_s16 = smov 0   ;;  %s805_s17 = smov 0  }
   0x7 LB: > { %s475_s18 = sadd.s32 4294967295, %s765_s17   ;;  %s476_s19 = sadd.s32 4294967294, %s765_s17   ;;  %s765_s17 = sphi %s805_s17, %s20_s17   ;;  %s761_s16 = sphi %s803_s16, %s996_s16   ;;  %s757_s15 = sphi %s801_s15, %s995_s15   ;;  %s753_s14 = sphi %s799_s14, %s994_s14   ;;  %s749_s13 = sphi %s797_s13, %s993_s13   ;;  %s745_s12 = sphi %s795_s12, %s992_s12  }
   0x8   : > { %p54_p0 = scmp.ne.s32.totalorder %s749_s13, %s745_s12  ;;  %p829_p1 = scmp.eq.s32.totalorder %s475_s18, 0 }
   0x9   : > { %p833_p2 = scmp.eq.s32.totalorder %s475_s18, 1  ;;  %p131_p3 = scmp.eq.s32.totalorder %s476_s19, 1 }
   0xa   : > { %s980_s20 = scalar_select %p829_p1, 1, 0 }
   0xb   : > { %p839_p4 = por %p829_p1, %p54_p0  ;;  %p477_p5 = scmp.ge.s32.totalorder %s765_s17, 1 }
   0xc   : > { %p844_p6 = por %p131_p3, %p54_p0  ;;  %p138_p7 = scmp.lt.s32.totalorder %s765_s17, 3 }
   0xd   : > { %s982_s22 = scalar_select %p839_p4, 1, 0 }
   0xe   : > { %s983_s23 = scalar_select %p844_p6, 1, 0 }
   0xf   : > { %p849_p8 = pnand %p477_p5, %p138_p7  ;;  %s767_s25 = smov [#allocation6]  }
  0x10   : > { %s153_s26 = sshll.u32 %s767_s25, 4  ;;  %s768_s28 = smov [#allocation8]   ;;  %s154_s26 = int_to_ptr.vmem [resolvable:$true] %s153_s26 }
  0x11   : > { %p524_p9 = pneg %p849_p8  ;;  %s167_s29 = sshll.u32 %s768_s28, 4  ;;  %s168_s29 = int_to_ptr.vmem [resolvable:$true] %s167_s29 }
  0x12   : > { %s612_s30 = scalar_lea.vmem %s154_s26, 512  ;;  %p620_p5 = scmp.lt.s32.totalorder %s154_s26, %s154_s26 }
  0x13   : > { %p858_p11 = pnand %p524_p9, %p829_p1  ;;  %p613_p13 = scmp.ne.s32.totalorder %s154_s26, %s612_s30 }
  0x14   : > { %p621_p7 = scmp.lt.s32.totalorder %s612_s30, %s612_s30 }
  0x15   : > { %p603_p12 = pneg %p858_p11 }
  0x16   : > { %p622_p10 = por %p621_p7, %p620_p5 }
  0x17   : > { %p615_p0 = pnand %p613_p13, %p603_p12 }
  0x19   : > { %p616_p3 = pneg %p615_p0 }
  0x1b   : > { %p623_p9 = pnand %p622_p10, %p616_p3 }
  0x1d   : > { %626 = shalt.err (!%p623_p9)
}
  0x1e   : > { %s769_s4 = smov 128   ;;  %s770_s5 = smov 8  }
  0x1f   : > { %527 = dma.hbm_to_vmem [thread:$0]  (!%p858_p11), %s974_s1, 512, %s154_s26, [#allocation7], %s769_s4, %s769_s4, %s770_s5  }
  0x20   : > { %s638_s8 = scalar_lea.vmem %s168_s29, 64  ;;  %p646_p1 = scmp.lt.s32.totalorder %s168_s29, %s168_s29 }
  0x21   : > { %p639_p6 = scmp.ne.s32.totalorder %s168_s29, %s638_s8  ;;  %p647_p4 = scmp.lt.s32.totalorder %s638_s8, %s638_s8 }
  0x23   : > { %p641_p13 = pnand %p639_p6, %p603_p12  ;;  %p648_p5 = por %p647_p4, %p646_p1 }
  0x25   : > { %p642_p0 = pneg %p641_p13 }
  0x27   : > { %p649_p10 = pnand %p648_p5, %p642_p0 }
  0x29   : > { %652 = shalt.err (!%p649_p10)
}
  0x2a   : > { %530 = dma.hbm_to_vmem [thread:$0]  (!%p858_p11), %s975_s2, 64, %s168_s29, [#allocation7]  }
  0x2b   : > { %s32_s11 = sadd.s32 1, %s761_s16  ;;  %s41_s18 = sadd.s32 1, %s753_s14 }
  0x2c   : > { %p34_p1 = scmp.ge.s32.totalorder %s32_s11, 2  ;;  %p48_p4 = scmp.ne.s32.totalorder %s753_s14, %s749_s13 }
  0x2d   : > { %p49_p6 = scmp.eq.s32.totalorder %s765_s17, 0  ;;  %p541_p12 = scmp.lt.s32.totalorder %s765_s17, 2 }
  0x2e   : > { %s998_s11 = smov (%p34_p1, %s32_s11), 0  ;;  %p890_p7 = por %p833_p2, %p48_p4 }
  0x2f   : > { %p50_p3 = por %p49_p6, %p48_p4  ;;  %s36_s25 = ssub.s32 %s761_s16, %s998_s11 }
  0x30   : > { %s178_s26 = sand.u32 1, %s753_s14   ;;  %p39_p9 = scmp.eq.s32.totalorder %s36_s25, 0 }
  0x31   : > { %s481_s27 = sshll.u32 %s178_s26, 3  ;;  %s482_s28 = sshll.u32 %s761_s16, 7 }
  0x32   : > { %s899_s29 = scalar_select %p39_p9, %s753_s14, %s41_s18  }
  0x33   : > { %s188_s5 = scalar_lea.hbm %s973_s0, %s482_s28  ;;  %s182_s6 = scalar_lea.vmem [#allocation3], %s481_s27 }
  0x34   : > { %s190_s7 = sshll.u32 %s182_s6, 4  ;;  %p906_p11 = pnand %p541_p12, %p50_p3  ;;  %s191_s7 = int_to_ptr.vmem [resolvable:$true] %s190_s7 }
  0x35   : > { %s179_s8 = scalar_lea.sflag [#allocation4], %s178_s26  ;;  %s666_s9 = scalar_lea.vmem %s191_s7, 128 }
  0x36   : > { %p655_p2 = pneg %p906_p11  ;;  %p667_p13 = scmp.ne.s32.totalorder %s191_s7, %s666_s9 }
  0x37   : > { %s771_s10 = smov [#allocation3]  }
  0x38   : > { %p669_p0 = pnand %p667_p13, %p655_p2  ;;  %s671_s18 = sshll.u32 %s771_s10, 4  ;;  %s672_s18 = int_to_ptr.vmem [resolvable:$false] %s671_s18 }
  0x39   : > { %s673_s25 = scalar_lea.vmem %s672_s18, 256  ;;  %p674_p10 = scmp.lt.s32.totalorder %s191_s7, %s672_s18 }
  0x3a   : > { %p670_p5 = pneg %p669_p0  ;;  %p675_p1 = scmp.lt.s32.totalorder %s673_s25, %s666_s9 }
  0x3c   : > { %p676_p4 = por %p675_p1, %p674_p10 }
  0x3e   : > { %p677_p6 = pnand %p676_p4, %p670_p5 }
  0x40   : > { %680 = shalt.err (!%p677_p6)
}
  0x41   : > { %534 = dma.hbm_to_vmem [thread:$0]  (!%p906_p11), %s188_s5, 128, %s191_s7, %s179_s8  }
  0x42   : > { %199 = sbr.rel (%p849_p8) target bundleno = 462 (0x1ce), region = 32  ;;  %s917_s26 = sand.u32 (!%p849_p8), 1, %s749_s13  }
  0x43   : > { %s484_s27 = sshll.u32 (!%p849_p8), %s917_s26, 3  ;;  %s202_s28 = scalar_lea.sflag (!%p849_p8), [#allocation4], %s917_s26 }
  0x44   : > { %s205_s30 = scalar_lea.vmem (!%p849_p8), [#allocation3], %s484_s27  ;;  %p988_p12 = scmp.ne.s32.totalorder (!%p849_p8), %s982_s22, 0 }
  0x47   : > { %732 = dma.done.wait (%p988_p12), %s202_s28, 128  }
  0x48   : > { %734 = vsyncadd (%p988_p12), %s202_s28, 4294967168  ;;  %p989_p3 = scmp.ne.s32.totalorder %s980_s20, 0 }
  0x4a   : > { %736 = dma.done.wait (%p989_p3), [#allocation7], 576  }
  0x4b   : > { %738 = vsyncadd (%p989_p3), [#allocation7], 4294966720  ;;  %v772_v0 = vmov 0.0   ;;  %vm773_vm0 = vmmov 0   ;;  %v247_v1 = vld [vmem:[#allocation6 + $0x18] sm:$0xff]  ;;  %v246_v2 = vld [vmem:[#allocation6 + $0x10] sm:$0xff] }
  0x4c   : > { %501 = vmatprep.subr.mxu0 %v772_v0  ;;  %509 = vmatprep.mubr.msk.f32.mxu0 %vm773_vm0, %v772_v0  ;;  %v245_v3 = vld [vmem:[#allocation6 + $0x8] sm:$0xff]  ;;  %v244_v4 = vld [vmem:[#allocation6] sm:$0xff]  ;;  %v243_v5 = vld [vmem:[%s205_s30] sm:$0xff]  ;;  %vm248_vm1 = vcmask 261120   ;;  %s493_s20 = sshll.u32 %s757_s15, 7  ;;  %s235_s22 = scalar_lea.vmem [#allocation9], %s484_s27 }
  0x4d   : > { %502 = vmatpush3.msra.mxu0 %v247_v1  ;;  %v489_v6 = vld [vmem:[#allocation8] ss:$0 sm:$0xff]  ;;  %v490_v21 = vld [vmem:[#allocation8 + $0x1] ss:$0 sm:$0xff]  ;;  %v491_v23 = vld [vmem:[#allocation8 + $0x2] ss:$0 sm:$0xff]  ;;  %s373_s6 = scalar_lea.hbm %s976_s3, %s493_s20 }
  0x4e   : > { %503 = vmatprep.subr.mxu0 %v772_v0  ;;  %s375_s24 = sshll.u32 %s235_s22, 4  ;;  %s362_s7 = scalar_lea.sflag [#allocation5], %s917_s26  ;;  %s376_s24 = int_to_ptr.vmem [resolvable:$true] %s375_s24 }
  0x4f   : > { %504 = vmatpush3.msra.mxu0 %v246_v2  ;;  %s681_s21 = scalar_lea.vmem %s376_s24, 128  ;;  %s774_s8 = smov [#allocation9]  }
  0x50   : > { %505 = vmatprep.subr.mxu0 %v772_v0  ;;  %p682_p8 = scmp.ne.s32.totalorder %s376_s24, %s681_s21  ;;  %s685_s9 = sshll.u32 %s774_s8, 4  ;;  %s686_s9 = int_to_ptr.vmem [resolvable:$false] %s685_s9 }
  0x51   : > { %506 = vmatpush3.msra.mxu0 %v245_v3  ;;  %s687_s15 = scalar_lea.vmem %s686_s9, 256  ;;  %p688_p2 = scmp.lt.s32.totalorder %s376_s24, %s686_s9 }
  0x52   : > { %507 = vmatprep.subr.mxu0 %v772_v0  ;;  %p683_p9 = pnand %p682_p8, %p890_p7  ;;  %p689_p13 = scmp.lt.s32.totalorder %s687_s15, %s681_s21 }
  0x53   : > { %508 = vmatpush3.msra.mxu0 %v244_v4 }
  0x54   : > { %510 = vmatmul.mubr.msk.f32.vlgmr.msra.gmra.mxu0 %vm248_vm1, %v243_v5  ;;  %p684_p11 = pneg %p683_p9  ;;  %p690_p0 = por %p689_p13, %p688_p2 }
  0x56   : > { %p691_p5 = pnand %p690_p0, %p684_p11 }
 0x114   : > { %v318_v7 = vpop.f32.mrf.mxu0 }
 0x115   : > { %v335_v8 = vadd.f32 %v489_v6, %v318_v7 }
 0x116   : > { %v511_v9 = vpop.f32.mrf.mxu0 }
 0x117   : > { %v336_v10 = vmax.f32 %v335_v8, 0.0 }
 0x119   : > { %337 = vadd.xlane.f32.xlu0 %v336_v10  ;;  %v340_v11 = vmul.f32 %v336_v10, %v336_v10 }
 0x11d   : > { %341 = vadd.xlane.f32.xlu0 %v340_v11 }
 0x1a2   : > { %v338_v12 = vpop.xlane.xlu0 %337 }
 0x1a3   : > { %v339_v13 = vmul.f32 0.03125, %v338_v12 }
 0x1a5   : > { %v344_v15 = vmul.f32 %v339_v13, %v339_v13  ;;  %v348_v19 = vsub.f32 %v336_v10, %v339_v13 }
 0x1a6   : > { %v342_v14 = vpop.xlane.xlu0 %341 }
 0x1a7   : > { %v343_v16 = vmul.f32 0.03125, %v342_v14 }
 0x1a9   : > { %v345_v17 = vsub.f32 %v343_v16, %v344_v15 }
 0x1ab   : > { %v346_v18 = vadd.f32 1e-05, %v345_v17 }
 0x1ad   : > { %599 = vrsqrt.f32 %v346_v18 }
 0x1ba   : > { %v600_v20 = vpop.eup %599 }
 0x1bb   : > { %v349_v22 = vmul.f32 %v600_v20, %v348_v19 }
 0x1bd   : > { %v354_v24 = vmul.f32 %v490_v21, %v349_v22 }
 0x1bf   : > { %v359_v25 = vadd.f32 %v491_v23, %v354_v24 }
 0x1c1   : > { %360 = vst [vmem:[%s235_s22] sm:$0xff] %v359_v25 }
 0x1c2   : > { %694 = shalt.err (!%p691_p5)
}
 0x1c3   : > { %s695_s10 = scalar_lea.hbm %s373_s6, 128  ;;  %s699_s26 = scalar_lea.hbm %s976_s3, 256 }
 0x1c4   : > { %p696_p10 = scmp.ne.s32.totalorder %s373_s6, %s695_s10  ;;  %p700_p6 = scmp.lt.s32.totalorder %s373_s6, %s976_s3 }
 0x1c5   : > { %p701_p12 = scmp.lt.s32.totalorder %s699_s26, %s695_s10 }
 0x1c6   : > { %p697_p1 = pnand %p696_p10, %p890_p7 }
 0x1c7   : > { %p702_p3 = por %p701_p12, %p700_p6 }
 0x1c8   : > { %p698_p4 = pneg %p697_p1 }
 0x1ca   : > { %p703_p8 = pnand %p702_p3, %p698_p4 }
 0x1cc   : > { %706 = shalt.err (!%p703_p8)
}
 0x1cd   : > { %522 = dma.vmem_to_hbm [thread:$0]  (%p890_p7), %s376_s24, 128, %s373_s6, %s362_s7  }
 0x1ce PF: > { %s387_s30 = sand.u32 1, %s745_s12   ;;  %p990_p9 = scmp.ne.s32.totalorder %s983_s23, 0 }
 0x1cf   : > { %p991_p11 = scmp.ge.s32.totalorder %s765_s17, 2  ;;  %s388_s20 = scalar_lea.sflag [#allocation5], %s387_s30 }
 0x1d1   : > { %p536_p2 = pnand %p991_p11, %p990_p9 }
 0x1d3   : > { %p537_p13 = pneg %p536_p2 }
 0x1d5   : > { %740 = dma.done.wait (%p537_p13), %s388_s20, 128  }
 0x1d6   : > { %742 = vsyncadd (%p537_p13), %s388_s20, 4294967168  ;;  %s20_s17 = sadd.s32 1, %s765_s17   ;;  %s992_s12 = smov %s749_s13 }
 0x1d7   : > { %p17_p0 = scmp.ge.s32.totalorder %s20_s17, 4   ;;  %s993_s13 = smov %s753_s14 }
 0x1d8   : > { %s994_s14 = smov %s899_s29  ;;  %s995_s15 = smov %s761_s16 }
 0x1d9   : > { %s996_s16 = smov %s998_s11  ;;  %19 = sbr.rel (!%p17_p0) target bundleno = 7 (0x7), region = 94 }
 0x1de   :  { %393 = vsyncpa [#allocation4], 1 }
 0x1df   :  { %395 = vsyncpa [#allocation4 + $0x1], 1 }
 0x1e0   :  { %396 = vsyncpa [#allocation7], 1 }
 0x1e1   :  { %397 = vsyncpa [#allocation5], 1 }
 0x1e2   :  { %399 = vsyncpa [#allocation5 + $0x1], 1 }

</bundles_post_ra>
